<compile_context>
chip_gen: v7x
topology: tpu7x:2x2x1
jax: 0.10.0
libtpu: 0.0.40
codegen_flags: <defaults>
</compile_context>

<pallas_src>
import functools

import jax
import jax.numpy as jnp
from jax.experimental import pallas as pl
from jax.experimental.pallas import tpu as pltpu


def _nin_kernel_single_k(x_ref, w_ref, b_ref, o_ref, *, compute_dtype):
    # x_ref: (tk, ts)   w_ref: (tn, tk)   b_ref: (tn, 1) f32   o_ref: (tn, ts)
    acc = jnp.dot(
        w_ref[...],
        x_ref[...].astype(compute_dtype),
        preferred_element_type=jnp.float32,
    )
    o_ref[...] = (acc + b_ref[...]).astype(o_ref.dtype)


def _nin_kernel_multi_k(x_ref, w_ref, b_ref, o_ref, acc_ref, *, compute_dtype):
    # C_in tiled over the last ("arbitrary") grid axis; f32 accumulator with the
    # bias folded into the k==0 init so the finalize is just a cast.
    k = pl.program_id(3)
    part = jnp.dot(
        w_ref[...],
        x_ref[...].astype(compute_dtype),
        preferred_element_type=jnp.float32,
    )

    @pl.when(k == 0)
    def _():
        acc_ref[...] = part + b_ref[...]

    @pl.when(k > 0)
    def _():
        acc_ref[...] += part

    @pl.when(k == pl.num_programs(3) - 1)
    def _():
        o_ref[...] = acc_ref[...].astype(o_ref.dtype)


def _round_up(x, m):
    return ((x + m - 1) // m) * m


def _vmem_capacity_bytes():
    try:
        return int(pltpu.get_tpu_info().vmem_capacity_bytes)
    except Exception:
        return 64 * 2**20  # conservative (v7x-sized) fallback


def _vmem_need_bytes(tn, tk, ts, in_isz, w_isz, out_isz, multi_k):
    need = (
        2 * tk * ts * in_isz      # x tile, double-buffered
        + 2 * tn * tk * w_isz     # weight tile, double-buffered
        + 2 * tn * 4              # bias (f32)
        + 2 * tn * ts * out_isz   # output tile, double-buffered
    )
    if multi_k:
        need += tn * ts * 4       # f32 accumulator scratch
    return need


def _pick_tiles(c_in, c_out, hw, in_isz, w_isz, out_isz, vmem_cap, ts_target):
    # Leave generous headroom for Mosaic internal scratch / semaphores.
    budget = vmem_cap // 2

    # Spatial (lane) tile: large, 128-aligned (unmasked vst), capped by HW.
    ts = min(_round_up(max(ts_target, 128), 128), _round_up(hw, 128))

    # Reduction tile: keep the weight fully resident whenever it fits a modest
    # VMEM slice (avoids re-DMA for every spatial tile); otherwise tile C_in,
    # preferring 256-multiples (v6e / v7x 2x256^2 MXU).
    weight_budget = min(8 * 2**20, budget // 4)
    if 2 * c_out * c_in * w_isz <= weight_budget:
        tk = c_in
    else:
        tk = c_in  # TODO(synk): non-128-divisible huge C_in falls back to a resident weight block.
        for cand in (512, 256, 128):
            if c_in % cand == 0:
                tk = cand
                break

    tn = c_out  # only tile C_out if the working set would crowd VMEM

    def need(tn_, ts_):
        return _vmem_need_bytes(tn_, tk, ts_, in_isz, w_isz, out_isz, tk < c_in)

    while ts > 256 and need(tn, ts) > budget:
        ts = _round_up(ts // 2, 128)
    while tn > 256 and need(tn, ts) > budget:
        tn = _round_up(tn // 2, 128)
    return tn, tk, ts


def network_in_network(x_nchw, v, g, b, *, ts_target=1024, compute_dtype=jnp.bfloat16):
    """Forward pass of NetworkInNetwork (1x1 conv with weight-normed Linear).

    x_nchw: (B, C_in, H, W);  v: (C_out, C_in);  g, b: (C_out,)
    Returns (B, C_out, H, W) in x's dtype.  The matmul runs in `compute_dtype`
    (default bf16 for the native MXU rate on v5e/v6e/v7x); accumulation is f32.
    Pass compute_dtype=jnp.float32 for exact f32 parity with the PyTorch ref.
    """
    B, C_in, H, W = x_nchw.shape
    C_out = v.shape[0]
    HW = H * W
    out_dtype = x_nchw.dtype
    compute_dtype = jnp.dtype(compute_dtype)

    # Weight-norm reparameterization (tiny parameter glue, plain JAX, f32).
    w = g[:, None] * v / jnp.linalg.norm(v, axis=1, keepdims=True)  # (C_out, C_in)
    w = w.astype(compute_dtype)
    b2d = b.reshape(C_out, 1).astype(jnp.float32)

    # NCHW stays NCHW: contiguous reshape only.  NOTE: no wrapper-side astype of
    # the activation — the cast happens per-tile inside the kernel.
    x3d = x_nchw.reshape(B, C_in, HW)

    in_isz = jnp.dtype(x_nchw.dtype).itemsize
    w_isz = compute_dtype.itemsize
    out_isz = jnp.dtype(out_dtype).itemsize

    vmem_cap = _vmem_capacity_bytes()
    tn, tk, ts = _pick_tiles(C_in, C_out, HW, in_isz, w_isz, out_isz, vmem_cap, ts_target)

    n_o = pl.cdiv(C_out, tn)
    n_s = pl.cdiv(HW, ts)
    n_k = pl.cdiv(C_in, tk)
    grid = (B, n_o, n_s, n_k)

    need = _vmem_need_bytes(tn, tk, ts, in_isz, w_isz, out_isz, n_k > 1)
    # Never ask for (nearly) the whole physical VMEM; leave Mosaic headroom.
    vmem_limit = int(min(vmem_cap * 3 // 4, max(need * 3 // 2, 32 * 2**20)))
    vmem_limit = max(vmem_limit, need)

    cost = pl.CostEstimate(
        flops=2 * B * HW * C_in * C_out,
        transcendentals=0,
        bytes_accessed=(
            in_isz * B * HW * C_in
            + w_isz * C_in * C_out
            + out_isz * B * HW * C_out
            + 4 * C_out
        ),
    )

    if n_k == 1:
        kernel = functools.partial(_nin_kernel_single_k, compute_dtype=compute_dtype)
        scratch_shapes = []
    else:
        kernel = functools.partial(_nin_kernel_multi_k, compute_dtype=compute_dtype)
        scratch_shapes = [pltpu.VMEM((tn, ts), jnp.float32)]

    out3d = pl.pallas_call(
        kernel,
        out_shape=jax.ShapeDtypeStruct((B, C_out, HW), out_dtype),
        grid_spec=pltpu.PrefetchScalarGridSpec(
            num_scalar_prefetch=0,
            grid=grid,
            in_specs=[
                # leading batch dim (size 1) squeezed out of the kernel view
                pl.BlockSpec((None, tk, ts), lambda bi, oi, si, ki: (bi, ki, si)),
                pl.BlockSpec((tn, tk), lambda bi, oi, si, ki: (oi, ki)),
                pl.BlockSpec((tn, 1), lambda bi, oi, si, ki: (oi, 0)),
            ],
            out_specs=pl.BlockSpec((None, tn, ts), lambda bi, oi, si, ki: (bi, oi, si)),
            scratch_shapes=scratch_shapes,
        ),
        compiler_params=pltpu.CompilerParams(
            dimension_semantics=("parallel", "parallel", "parallel", "arbitrary"),
            vmem_limit_bytes=vmem_limit,
        ),
        cost_estimate=cost,
    )(x3d, w, b2d)

    return out3d.reshape(B, C_out, H, W)


if __name__ == "__main__":
    key = jax.random.PRNGKey(0)
    k_x, k_v, k_g, k_b = jax.random.split(key, 4)

    B, C_in, H, W = 2, 4, 16, 16
    C_out = 8

    x = jax.random.normal(k_x, (B, C_in, H, W), dtype=jnp.float32)
    v = jax.random.normal(k_v, (C_out, C_in), dtype=jnp.float32) * 0.05
    g = 1.0 + 0.1 * jax.random.normal(k_g, (C_out,), dtype=jnp.float32)
    b = 0.1 * jax.random.normal(k_b, (C_out,), dtype=jnp.float32)

    # Plain-JAX reference (weight-normed 1x1 conv).
    w_ref = g[:, None] * v / jnp.linalg.norm(v, axis=1, keepdims=True)
    ref = jnp.einsum("bchw,oc->bohw", x, w_ref) + b[None, :, None, None]

    # Exact-precision path (f32 matmul).
    out_f32 = jax.block_until_ready(
        network_in_network(x, v, g, b, compute_dtype=jnp.float32)
    )
    assert out_f32.shape == (B, C_out, H, W)
    assert jnp.allclose(out_f32, ref, atol=1e-5, rtol=1e-5), float(
        jnp.max(jnp.abs(out_f32 - ref))
    )

    # Default fast path (bf16 matmul, f32 accumulation) — bf16-level tolerance.
    out_bf16 = jax.block_until_ready(network_in_network(x, v, g, b))
    assert out_bf16.shape == (B, C_out, H, W)
    assert jnp.allclose(out_bf16, ref, atol=5e-2, rtol=5e-2), float(
        jnp.max(jnp.abs(out_bf16 - ref))
    )

    print("KERNEL_OK")
</pallas_src>

<mosaic_0001>
module attributes {stable_mosaic.version = 11 : i64} {
  func.func @_nin_kernel_single_k(%arg0: i32, %arg1: i32, %arg2: i32, %arg3: i32, %arg4: memref<1x4x256xf32, #tpu.memory_space<vmem>>, %arg5: memref<8x4xf32, #tpu.memory_space<vmem>>, %arg6: memref<8x1xf32, #tpu.memory_space<vmem>>, %arg7: memref<1x8x256xf32, #tpu.memory_space<vmem>>) attributes {dimension_semantics = [#tpu.dimension_semantics<parallel>, #tpu.dimension_semantics<parallel>, #tpu.dimension_semantics<parallel>, #tpu.dimension_semantics<arbitrary>], iteration_bounds = array<i64: 2, 1, 1, 1>, scalar_prefetch = 0 : i64, scratch_operands = 0 : i64, tpu.core_type = #tpu.core_type<tc>, window_params = [{transform_indices = @transform_0, window_bounds = array<i64: 1, 4, 256>}, {transform_indices = @transform_1, window_bounds = array<i64: 8, 4>}, {transform_indices = @transform_2, window_bounds = array<i64: 8, 1>}, {transform_indices = @transform_3, window_bounds = array<i64: 1, 8, 256>}]} {
    %c0 = arith.constant 0 : index
    %c0_0 = arith.constant 0 : index
    %0 = vector.load %arg5[%c0, %c0_0] : memref<8x4xf32, #tpu.memory_space<vmem>>, vector<8x4xf32>
    %c0_1 = arith.constant 0 : index
    %c0_2 = arith.constant 0 : index
    %c0_3 = arith.constant 0 : index
    %1 = vector.load %arg4[%c0_1, %c0_2, %c0_3] : memref<1x4x256xf32, #tpu.memory_space<vmem>>, vector<1x4x256xf32>
    %2 = vector.shape_cast %1 : vector<1x4x256xf32> to vector<4x256xf32>
    %cst = arith.constant dense<0.000000e+00> : vector<8x256xf32>
    %3 = tpu.matmul %0, %2, %cst {dimension_numbers = #tpu.dot_dimension_numbers<[1], [0], [0], [1], [0, 0, 1, 1], [], []>} : vector<8x4xf32>, vector<4x256xf32>, vector<8x256xf32> -> vector<8x256xf32>
    %c0_4 = arith.constant 0 : index
    %c0_5 = arith.constant 0 : index
    %4 = vector.load %arg6[%c0_4, %c0_5] : memref<8x1xf32, #tpu.memory_space<vmem>>, vector<8x1xf32>
    %5 = vector.broadcast %4 : vector<8x1xf32> to vector<8x256xf32>
    %6 = arith.addf %3, %5 : vector<8x256xf32>
    %c0_6 = arith.constant 0 : index
    %c0_7 = arith.constant 0 : index
    %c0_8 = arith.constant 0 : index
    %7 = vector.load %arg7[%c0_6, %c0_7, %c0_8] : memref<1x8x256xf32, #tpu.memory_space<vmem>>, vector<1x8x256xf32>
    %8 = vector.shape_cast %7 : vector<1x8x256xf32> to vector<8x256xf32>
    %9 = vector.shape_cast %6 : vector<8x256xf32> to vector<1x8x256xf32>
    tpu.vector_store %arg7[%c0_6, %c0_7, %c0_8], %9 {strides = array<i32>} : memref<1x8x256xf32, #tpu.memory_space<vmem>>, vector<1x8x256xf32>,
    return
  }
  func.func @transform_0(%arg0: i32, %arg1: i32, %arg2: i32, %arg3: i32) -> (i32, i32, i32) {
    %c0_i32 = arith.constant 0 : i32
    return %arg0, %arg3, %arg2 : i32, i32, i32
  }
  func.func @transform_1(%arg0: i32, %arg1: i32, %arg2: i32, %arg3: i32) -> (i32, i32) {
    %c0_i32 = arith.constant 0 : i32
    return %arg1, %arg3 : i32, i32
  }
  func.func @transform_2(%arg0: i32, %arg1: i32, %arg2: i32, %arg3: i32) -> (i32, i32) {
    %c0_i32 = arith.constant 0 : i32
    %c0_i32_0 = arith.constant 0 : i32
    return %arg1, %c0_i32 : i32, i32
  }
  func.func @transform_3(%arg0: i32, %arg1: i32, %arg2: i32, %arg3: i32) -> (i32, i32, i32) {
    %c0_i32 = arith.constant 0 : i32
    return %arg0, %arg1, %arg2 : i32, i32, i32
  }
}

</mosaic_0001>

<bundles_post_ra>
// kernel: tpu_custom_call.1
= control target key start
LH: loop header
LB: loop body
LE: loop exit
PB: predicated region body
PF: predicated region fallthrough
CT: control target
= control target key end

     0   :  { %8 = vsyncpa [#allocation3], 0  ;;  %s809_s0 = inlined_call_operand.vmem [shape: f32[2,4,256], index: 0, kind: input, shape index: {}]   ;;  %s810_s1 = inlined_call_operand.vmem [shape: f32[8,4], index: 1, kind: input, shape index: {}]   ;;  %s811_s2 = inlined_call_operand.vmem [shape: f32[8,1], index: 2, kind: input, shape index: {}]   ;;  %s812_s3 = inlined_call_operand.hbm [shape: f32[2,8,256], index: 3, kind: output, shape index: {}]  }
   0x1   :  { %10 = vsyncpa [#allocation3 + $0x1], 0  ;;  %s691_s12 = smov 0   ;;  %s693_s13 = smov 0  }
   0x2   :  { %s695_s14 = smov 0   ;;  %s697_s15 = smov 0  }
   0x3   :  { %s699_s16 = smov 0   ;;  %s701_s17 = smov 0  }
   0x4 LB: > { %s509_s18 = sadd.s32 4294967295, %s666_s17   ;;  %s510_s19 = sadd.s32 4294967294, %s666_s17   ;;  %s666_s17 = sphi %s701_s17, %s16_s17   ;;  %s662_s16 = sphi %s699_s16, %s819_s16   ;;  %s658_s15 = sphi %s697_s15, %s818_s15   ;;  %s654_s14 = sphi %s695_s14, %s817_s14   ;;  %s650_s13 = sphi %s693_s13, %s816_s13   ;;  %s646_s12 = sphi %s691_s12, %s815_s12  }
   0x5   : > { %s42_s20 = sadd.s32 1, %s662_s16  ;;  %s137_s21 = sadd.s32 1, %s654_s14 }
   0x6   : > { %p44_p0 = scmp.ge.s32.totalorder %s42_s20, 2  ;;  %p147_p1 = scmp.ne.s32.totalorder %s654_s14, %s650_s13 }
   0x7   : > { %p148_p2 = scmp.eq.s32.totalorder %s509_s18, 1  ;;  %p153_p3 = scmp.ne.s32.totalorder %s650_s13, %s646_s12 }
   0x8   : > { %s821_s20 = smov (%p44_p0, %s42_s20), 0  ;;  %p154_p5 = scmp.eq.s32.totalorder %s510_s19, 1 }
   0x9   : > { %p731_p4 = por %p148_p2, %p147_p1  ;;  %s130_s23 = ssub.s32 %s662_s16, %s821_s20 }
   0xa   : > { %p515_p6 = scmp.ge.s32.totalorder %s666_s17, 1  ;;  %p135_p7 = scmp.eq.s32.totalorder %s130_s23, 0 }
   0xb   : > { %p738_p8 = por %p154_p5, %p153_p3  ;;  %p206_p9 = scmp.lt.s32.totalorder %s666_s17, 3 }
   0xc   : > { %s744_s25 = scalar_select %p135_p7, %s654_s14, %s137_s21  }
   0xd   : > { %p207_p10 = pnand %p515_p6, %p206_p9 }
   0xe   : > { %p250_p11 = scmp.lt.s32.totalorder (!%p207_p10), %s658_s15, 1  ;;  %v668_v0 = vmov (!%p207_p10), 0.0   ;;  %v669_v1 = vmov (!%p207_p10), 0   ;;  %v277_v2 = vld [vmem:[%s811_s2] sm:$0xff] (!%p207_p10)  ;;  %vm289_vm0 = vcmask (!%p207_p10), 1043456   ;;  %vm285_vm1 = vcmask (!%p207_p10), 31744  }
   0xf   : > { %210 = sbr.rel (%p207_p10) target bundleno = 260 (0x104), region = 32  ;;  %358 = vmatprep.mubr.f32.mxu0 (!%p207_p10), %v668_v0  ;;  %586 = vset.pattern.permute.xlu0 (!%p207_p10), %v669_v1  ;;  %v275_v5 = vld [vmem:[%s810_s1] sm:$0xff] (!%p207_p10)  ;;  %s246_s8 = sand.u32 (!%p207_p10), 1, %s650_s13  }
  0x10   : > { %280 = vperm.xlu0 (!%p207_p10), %586, %v277_v2   ;;  %s516_s9 = sshll.u32 (!%p207_p10), %s246_s8, 4  ;;  %s528_s10 = sshll.u32 (!%p207_p10), %s658_s15, 8 }
  0x11   : > { %s248_s11 = scalar_lea.vmem (!%p207_p10), [#allocation2], %s516_s9  ;;  %s762_s23 = scalar_lea.hbm (!%p207_p10), %s812_s3, %s528_s10 }
  0x12   : > { %s386_s18 = sshll.u32 (!%p207_p10), %s248_s11, 4  ;;  %s368_s26 = scalar_lea.sflag (!%p207_p10), [#allocation3], %s246_s8  ;;  %s764_s18 = int_to_ptr.vmem [resolvable:$true] %s386_s18 }
  0x13   : > { %s670_s27 = smov (!%p207_p10), [#allocation2]  }
  0x16   : > { %s251_s28 = scalar_select %p250_p11, %s658_s15, 1 }
  0x17   : > { %s588_s15 = scalar_lea.vmem %s764_s18, 256 }
  0x18   : > { %s527_s29 = sshll.u32 %s251_s28, 3  ;;  %p589_p12 = scmp.ne.s32.totalorder %s764_s18, %s588_s15 }
  0x19   : > { %s261_s5 = scalar_lea.vmem %s809_s0, %s527_s29  ;;  %s592_s28 = sshll.u32 %s670_s27, 4  ;;  %s593_s28 = int_to_ptr.vmem [resolvable:$false] %s592_s28 }
  0x1a   : > { %v276_v3 = vld [vmem:[%s261_s5] sm:$0xff]  ;;  %p590_p13 = pnand %p589_p12, %p731_p4  ;;  %s594_s29 = scalar_lea.vmem %s593_s28, 512 }
  0x1b   : > { %v284_v4 = vcombine.high %v276_v3, %v276_v3  ;;  %p595_p1 = scmp.lt.s32.totalorder %s764_s18, %s593_s28  ;;  %p596_p2 = scmp.lt.s32.totalorder %s594_s29, %s588_s15 }
  0x1c   : > { %p591_p0 = pneg %p590_p13 }
  0x1d   : > { %519 = vmatprep.subr.msk.mxu0 %vm289_vm0, %v284_v4  ;;  %p597_p3 = por %p596_p2, %p595_p1 }
  0x1e   : > { %520 = vmatpush1.msk.msra.mxu0 %vm289_vm0, %v276_v3 }
  0x1f   : > { %521 = vmatmul.mubr.msk.f32.vlgmr.msra.gmra.mrb[0].mxu0 %vm285_vm1, %v275_v5  ;;  %p598_p5 = pnand %p597_p3, %p591_p0 }
  0x8f   : > { %v281_v6 = vpop.permute.xlu0 %280 }
  0xf2   : > { %v360_v7 = vpop.f32.mrb[0].mxu0 }
  0xf3   : > { %v361_v8 = vadd.f32 %v360_v7, %v281_v6  ;;  %v362_v9 = vpop.f32.mrb[1].mxu0 }
  0xf4   : > { %v363_v10 = vadd.f32 %v362_v9, %v281_v6 }
  0xf5   : > { %365 = vst [vmem:[%s248_s11] sm:$0xff] %v361_v8 }
  0xf6   : > { %366 = vst [vmem:[%s248_s11 + $0x8] sm:$0xff] %v363_v10 }
  0xf7   : > { %601 = shalt.err (!%p598_p5)
}
  0xf8   : > { %s602_s30 = scalar_lea.hbm %s762_s23, 256  ;;  %s606_s6 = scalar_lea.hbm %s812_s3, 512 }
  0xf9   : > { %p603_p6 = scmp.ne.s32.totalorder %s762_s23, %s602_s30  ;;  %p607_p10 = scmp.lt.u32.totalorder %s762_s23, %s812_s3 }
  0xfa   : > { %p608_p11 = scmp.lt.u32.totalorder %s606_s6, %s602_s30  ;;  %p610_p13 = scmp.lt.u32.totalorder %s602_s30, %s762_s23 }
  0xfb   : > { %p604_p7 = pnand %p603_p6, %p731_p4 }
  0xfc   : > { %p609_p12 = por %p608_p11, %p607_p10 }
  0xfd   : > { %p605_p9 = pneg %p604_p7 }
  0xfe   : > { %p611_p0 = por %p610_p13, %p609_p12 }
 0x100   : > { %p612_p1 = pnand %p611_p0, %p605_p9 }
 0x102   : > { %615 = shalt.err (!%p612_p1)
}
 0x103   : > { %529 = dma.vmem_to_hbm [thread:$0]  (%p731_p4), %s764_s18, 256, %s762_s23, %s368_s26  }
 0x104 PF: > { %p535_p2 = scmp.ge.s32.totalorder %s666_s17, 2  ;;  %s398_s9 = sand.u32 1, %s646_s12  }
 0x105   : > { %s399_s10 = scalar_lea.sflag [#allocation3], %s398_s9 }
 0x106   : > { %p532_p3 = pnand %p535_p2, %p738_p8 }
 0x108   : > { %641 = dma.done.wait (!%p532_p3), %s399_s10, 256  }
 0x109   : > { %643 = vsyncadd (!%p532_p3), %s399_s10, 4294967040  ;;  %s16_s17 = sadd.s32 1, %s666_s17   ;;  %s815_s12 = smov %s650_s13 }
 0x10a   : > { %p13_p5 = scmp.ge.s32.totalorder %s16_s17, 4   ;;  %s816_s13 = smov %s654_s14 }
 0x10b   : > { %s817_s14 = smov %s744_s25  ;;  %s818_s15 = smov %s662_s16 }
 0x10c   : > { %s819_s16 = smov %s821_s20  ;;  %15 = sbr.rel (!%p13_p5) target bundleno = 4 (0x4), region = 73 }
 0x113   :  { %404 = vsyncpa [#allocation3], 1 }
 0x114   :  { %406 = vsyncpa [#allocation3 + $0x1], 1 }

</bundles_post_ra>
